<compile_context>
chip_gen: v7x
topology: tpu7x:2x2x1
jax: 0.10.0
libtpu: 0.0.40
codegen_flags: <defaults>
</compile_context>

<pallas_src>
import math
from functools import partial

import jax
import jax.numpy as jnp
from jax.experimental import pallas as pl
from jax.experimental.pallas import tpu as pltpu


EPS = 1e-6


# ---------------------------------------------------------------------------
# Kernels
# ---------------------------------------------------------------------------

def _rmsnorm(x, ln_w):
    xf = x.astype(jnp.float32)
    var = jnp.mean(xf * xf, axis=-1, keepdims=True)
    xn = (xf * jax.lax.rsqrt(var + EPS)).astype(x.dtype)
    return xn * ln_w


def _ffn_fast_kernel(x_ref, ln_w_ref, w0_ref, w1_ref, wout_ref, o_ref):
    """Weights-resident path: 1-D grid over row tiles, full F per step.

    Weight index maps are constant over the grid, so w0/w1/wout are DMA'd
    from HBM once and reused for every row tile.
    """
    x = x_ref[...]                                            # (tm, D) bf16
    xn = _rmsnorm(x, ln_w_ref[...])                           # (tm, D) bf16

    gate = jnp.dot(xn, w0_ref[...], preferred_element_type=jnp.float32)
    up = jnp.dot(xn, w1_ref[...], preferred_element_type=jnp.float32)
    h = (gate * jax.nn.sigmoid(gate) * up).astype(x.dtype)    # (tm, F) bf16

    out = jnp.dot(h, wout_ref[...], preferred_element_type=jnp.float32)
    o_ref[...] = x + out.astype(o_ref.dtype)                  # residual add


def _ffn_tiled_kernel(x_ref, ln_w_ref, w0_ref, w1_ref, wout_ref, o_ref,
                      xn_ref, acc_ref):
    """Tiled path: 2-D grid (row tiles parallel, ffn tiles arbitrary),
    f32 VMEM accumulator over the ffn axis."""
    f = pl.program_id(1)

    # ---- init: RMSNorm once per row tile, zero the f32 accumulator ----
    @pl.when(f == 0)
    def _():
        xn_ref[...] = _rmsnorm(x_ref[...], ln_w_ref[...])
        acc_ref[...] = jnp.zeros_like(acc_ref)

    xn = xn_ref[...]                                          # (tm, D) bf16

    gate = jnp.dot(xn, w0_ref[...], preferred_element_type=jnp.float32)
    up = jnp.dot(xn, w1_ref[...], preferred_element_type=jnp.float32)
    h = (gate * jax.nn.sigmoid(gate) * up).astype(x_ref.dtype)  # (tm, tf) bf16

    # ---- down projection, accumulated over ffn tiles in f32 ----
    acc_ref[...] += jnp.dot(h, wout_ref[...], preferred_element_type=jnp.float32)

    # ---- finalize: cast to bf16 and add the residual ----
    @pl.when(f == pl.num_programs(1) - 1)
    def _():
        o_ref[...] = x_ref[...] + acc_ref[...].astype(o_ref.dtype)


# ---------------------------------------------------------------------------
# Weight packing (one-time, PyTorch layout -> kernel layout)
# ---------------------------------------------------------------------------

def prepare_ffn_weights(ln_weight, w0, w1, w_out):
    """ln_weight: (D,) -> (1, D); w0/w1: (F, D) -> (D, F); w_out: (D, F) -> (F, D).

    Layout is independent of the kernel tile sizes (no interleaving), so the
    tile heuristics can never scramble the gate/up split.
    """
    D = ln_weight.shape[0]
    return ln_weight.reshape(1, D), w0.T, w1.T, w_out.T


# ---------------------------------------------------------------------------
# VMEM / tile sizing (generation-aware)
# ---------------------------------------------------------------------------

def _vmem_capacity_bytes():
    try:
        return int(pltpu.get_tpu_info().vmem_capacity_bytes)
    except Exception:
        return 64 * 1024 * 1024  # conservative fallback (v7x per-TC size)


def _fast_path_bytes(tm, D, F):
    """Estimated VMEM footprint of the weights-resident path (2 buffers for
    every BlockSpec operand + in-kernel temporaries)."""
    return (4 * tm * D          # x tile (bf16, 2 bufs)
            + 4 * tm * D        # out tile (bf16, 2 bufs)
            + 4 * D             # rmsnorm weight (bf16, 2 bufs)
            + 12 * D * F        # W0^T + W1^T + Wout^T (bf16, 2 bufs each)
            + 2 * tm * D        # xn bf16 temp
            + 8 * tm * F        # gate + up f32 temps
            + 2 * tm * F        # h bf16 temp
            + 4 * tm * D)       # down-proj f32 temp


def _tiled_path_bytes(tm, D, tf):
    """Estimated VMEM footprint of the tiled (accumulating) path."""
    return (4 * tm * D          # x tile (bf16, 2 bufs)
            + 4 * tm * D        # out tile (bf16, 2 bufs)
            + 4 * D             # rmsnorm weight
            + 12 * D * tf       # W0^T/W1^T/Wout^T tiles (bf16, 2 bufs each)
            + 2 * tm * D        # xn scratch (bf16)
            + 4 * tm * D        # acc scratch (f32)
            + 8 * tm * tf       # gate + up f32 temps
            + 2 * tm * tf       # h bf16 temp
            + 4 * tm * D)       # down-proj f32 temp before +=


_TM_CANDS = (1024, 768, 512, 384, 256, 128, 64, 32, 16, 8)
_TF_CANDS_PREF = (2048, 1024, 512, 256)   # keep MXU 256-wide on v6e/v7x
_TF_CANDS_FALL = (128,)


def _choose_tiles(M, D, F, vmem_cap):
    budget = int(vmem_cap * 0.8)   # headroom for compiler-internal scratch
    tm_cands = [c for c in _TM_CANDS if c <= M and M % c == 0]
    if not tm_cands:
        tm_cands = [M]

    # Fast path: all weights resident in VMEM, single ffn step, weights
    # DMA'd once for the whole call.  Prefer the largest row tile that fits.
    for tm in tm_cands:
        if _fast_path_bytes(tm, D, F) <= budget:
            return tm, F

    # Tiled path: large tm amortizes weight re-streaming (it is re-fetched
    # once per row tile), so shrink tf before tm; prefer tf >= 256.
    tf_pref = [c for c in _TF_CANDS_PREF if c <= F and F % c == 0]
    tf_fall = [c for c in _TF_CANDS_FALL if c <= F and F % c == 0]
    for tf_list in (tf_pref, tf_pref + tf_fall):
        for tm in tm_cands:
            for tf in tf_list:
                if _tiled_path_bytes(tm, D, tf) <= budget:
                    return tm, tf

    # Last resort: smallest tiles.
    tf = (tf_fall or tf_pref or [F])[-1]
    return tm_cands[-1], tf


# ---------------------------------------------------------------------------
# pallas_call wrappers
# ---------------------------------------------------------------------------

@partial(jax.jit, static_argnames=("tm",))
def _ffn_fast_call(x2d, ln_w, w0_t, w1_t, wout_t, *, tm):
    M, D = x2d.shape
    F = w0_t.shape[1]
    vmem_cap = _vmem_capacity_bytes()
    vmem_limit = int(min(max(int(1.5 * _fast_path_bytes(tm, D, F)),
                             32 * 1024 * 1024), vmem_cap))

    return pl.pallas_call(
        _ffn_fast_kernel,
        out_shape=jax.ShapeDtypeStruct((M, D), x2d.dtype),
        grid_spec=pltpu.PrefetchScalarGridSpec(
            num_scalar_prefetch=0,
            grid=(M // tm,),
            in_specs=[
                pl.BlockSpec((tm, D), lambda i: (i, 0)),   # hidden rows
                pl.BlockSpec((1, D), lambda i: (0, 0)),    # rmsnorm weight
                pl.BlockSpec((D, F), lambda i: (0, 0)),    # W0^T (resident)
                pl.BlockSpec((D, F), lambda i: (0, 0)),    # W1^T (resident)
                pl.BlockSpec((F, D), lambda i: (0, 0)),    # Wout^T (resident)
            ],
            out_specs=pl.BlockSpec((tm, D), lambda i: (i, 0)),
        ),
        compiler_params=pltpu.CompilerParams(
            dimension_semantics=("parallel",),
            vmem_limit_bytes=vmem_limit),
    )(x2d, ln_w, w0_t, w1_t, wout_t)


@partial(jax.jit, static_argnames=("tm", "tf"))
def _ffn_tiled_call(x2d, ln_w, w0_t, w1_t, wout_t, *, tm, tf):
    M, D = x2d.shape
    F = w0_t.shape[1]
    dtype = x2d.dtype
    vmem_cap = _vmem_capacity_bytes()
    vmem_limit = int(min(max(int(1.5 * _tiled_path_bytes(tm, D, tf)),
                             32 * 1024 * 1024), vmem_cap))

    return pl.pallas_call(
        _ffn_tiled_kernel,
        out_shape=jax.ShapeDtypeStruct((M, D), dtype),
        grid_spec=pltpu.PrefetchScalarGridSpec(
            num_scalar_prefetch=0,
            grid=(M // tm, F // tf),
            in_specs=[
                pl.BlockSpec((tm, D), lambda i, f: (i, 0)),   # hidden rows
                pl.BlockSpec((1, D), lambda i, f: (0, 0)),    # rmsnorm weight
                pl.BlockSpec((D, tf), lambda i, f: (0, f)),   # W0^T tile
                pl.BlockSpec((D, tf), lambda i, f: (0, f)),   # W1^T tile
                pl.BlockSpec((tf, D), lambda i, f: (f, 0)),   # Wout^T tile
            ],
            out_specs=pl.BlockSpec((tm, D), lambda i, f: (i, 0)),
            scratch_shapes=[
                pltpu.VMEM((tm, D), dtype),        # normalized input (bf16)
                pltpu.VMEM((tm, D), jnp.float32),  # down-proj accumulator
            ],
        ),
        compiler_params=pltpu.CompilerParams(
            dimension_semantics=("parallel", "arbitrary"),
            vmem_limit_bytes=vmem_limit),
    )(x2d, ln_w, w0_t, w1_t, wout_t)


def ffn_block(hidden_states, ln_w, w0_t, w1_t, wout_t, *, tm=None, tf=None):
    """hidden_states: (B, S, D) bf16.  ln_w / w0_t / w1_t / wout_t from
    prepare_ffn_weights."""
    B, S, D = hidden_states.shape
    F_dim = w0_t.shape[1]
    M = B * S

    assert D % 128 == 0 and F_dim % 128 == 0
    assert ln_w.shape == (1, D)
    assert w0_t.shape == (D, F_dim) and w1_t.shape == (D, F_dim)
    assert wout_t.shape == (F_dim, D)

    vmem_cap = _vmem_capacity_bytes()
    auto_tm, auto_tf = _choose_tiles(M, D, F_dim, vmem_cap)
    if tm is None:
        tm = auto_tm
    if tf is None:
        tf = auto_tf
    assert M % tm == 0 and F_dim % tf == 0
    assert tm == M or tm % 8 == 0

    x2d = hidden_states.reshape(M, D)
    if tf == F_dim:
        out2d = _ffn_fast_call(x2d, ln_w, w0_t, w1_t, wout_t, tm=tm)
    else:
        out2d = _ffn_tiled_call(x2d, ln_w, w0_t, w1_t, wout_t, tm=tm, tf=tf)
    return out2d.reshape(B, S, D)


# ---------------------------------------------------------------------------
# Reference + test
# ---------------------------------------------------------------------------

def _reference(hidden_states, ln_weight, w0, w1, w_out):
    """Pure-JAX reference mirroring the PyTorch forward (and kernel math)."""
    xf = hidden_states.astype(jnp.float32)
    var = jnp.mean(xf * xf, axis=-1, keepdims=True)
    xn = (xf * jax.lax.rsqrt(var + EPS)).astype(hidden_states.dtype)
    xn = xn * ln_weight
    gate = jnp.einsum("bsd,fd->bsf", xn, w0,
                      preferred_element_type=jnp.float32)
    up = jnp.einsum("bsd,fd->bsf", xn, w1,
                    preferred_element_type=jnp.float32)
    h = (gate * jax.nn.sigmoid(gate) * up).astype(hidden_states.dtype)
    out = jnp.einsum("bsf,df->bsd", h, w_out,
                     preferred_element_type=jnp.float32).astype(xn.dtype)
    return hidden_states + out


if __name__ == "__main__":
    B, S, D, F_dim = 2, 8, 256, 512      # batch, seq_len, dim_model, dim_ff
    dtype = jnp.bfloat16
    init_std = 0.02

    key = jax.random.PRNGKey(0)
    k_x, k0, k1, k2 = jax.random.split(key, 4)

    hidden = jax.random.normal(k_x, (B, S, D), jnp.float32).astype(dtype)
    ln_weight = jnp.ones((D,), dtype)    # LayerNorm init_var = 1.0 (default)
    w0 = (init_std * jax.random.normal(k0, (F_dim, D), jnp.float32)).astype(dtype)
    w1 = (init_std * jax.random.normal(k1, (F_dim, D), jnp.float32)).astype(dtype)
    w_out = (init_std * jax.random.normal(k2, (D, F_dim), jnp.float32)).astype(dtype)

    # One-time weight packing (stored pre-transposed, tile-size independent).
    ln_w, w0_t, w1_t, wout_t = prepare_ffn_weights(ln_weight, w0, w1, w_out)

    ref = _reference(hidden, ln_weight, w0, w1, w_out)

    # 1) Auto tile selection -> weights-resident fast path at this size.
    out = ffn_block(hidden, ln_w, w0_t, w1_t, wout_t)
    out = jax.block_until_ready(out)
    err = jnp.max(jnp.abs(out.astype(jnp.float32) - ref.astype(jnp.float32)))
    assert out.shape == (B, S, D) and out.dtype == dtype
    assert float(err) < 5e-2, f"fast path mismatch vs reference: {err}"

    # 2) Explicit small tiles -> exercises the f32-accumulator tiled path.
    out2 = ffn_block(hidden, ln_w, w0_t, w1_t, wout_t, tm=8, tf=256)
    out2 = jax.block_until_ready(out2)
    err2 = jnp.max(jnp.abs(out2.astype(jnp.float32) - ref.astype(jnp.float32)))
    assert float(err2) < 5e-2, f"tiled path mismatch vs reference: {err2}"

    # FFNBlock.forward returns a dict; the non-hidden entries are None for the
    # dense (num_experts=0) configuration reproduced here.
    # TODO(synk): MoE routing path (num_experts > 0) not implemented.
    result = {"hidden_states": out, "balance_loss": None,
              "load": None, "router_entropy": None}

    print("KERNEL_OK")
</pallas_src>

<mosaic_0001>
module attributes {stable_mosaic.version = 11 : i64} {
  func.func @_ffn_fast_kernel(%arg0: i32, %arg1: memref<16x256xbf16, #tpu.memory_space<vmem>>, %arg2: memref<1x256xbf16, #tpu.memory_space<vmem>>, %arg3: memref<256x512xbf16, #tpu.memory_space<vmem>>, %arg4: memref<256x512xbf16, #tpu.memory_space<vmem>>, %arg5: memref<512x256xbf16, #tpu.memory_space<vmem>>, %arg6: memref<16x256xbf16, #tpu.memory_space<vmem>>) attributes {dimension_semantics = [#tpu.dimension_semantics<parallel>], iteration_bounds = array<i64: 1>, scalar_prefetch = 0 : i64, scratch_operands = 0 : i64, tpu.core_type = #tpu.core_type<tc>, window_params = [{transform_indices = @transform_0, window_bounds = array<i64: 16, 256>}, {pipeline_mode = #tpu.pipeline_mode<synchronous>, transform_indices = @transform_1, window_bounds = array<i64: 1, 256>}, {pipeline_mode = #tpu.pipeline_mode<synchronous>, transform_indices = @transform_2, window_bounds = array<i64: 256, 512>}, {pipeline_mode = #tpu.pipeline_mode<synchronous>, transform_indices = @transform_3, window_bounds = array<i64: 256, 512>}, {pipeline_mode = #tpu.pipeline_mode<synchronous>, transform_indices = @transform_4, window_bounds = array<i64: 512, 256>}, {transform_indices = @transform_5, window_bounds = array<i64: 16, 256>}]} {
    %c0 = arith.constant 0 : index
    %c0_0 = arith.constant 0 : index
    %0 = vector.load %arg1[%c0, %c0_0] : memref<16x256xbf16, #tpu.memory_space<vmem>>, vector<16x256xbf16>
    %c0_1 = arith.constant 0 : index
    %c0_2 = arith.constant 0 : index
    %1 = vector.load %arg2[%c0_1, %c0_2] : memref<1x256xbf16, #tpu.memory_space<vmem>>, vector<1x256xbf16>
    %2 = arith.extf %0 : vector<16x256xbf16> to vector<16x256xf32>
    %3 = arith.mulf %2, %2 : vector<16x256xf32>
    %cst = arith.constant dense<0.000000e+00> : vector<16xf32>
    %4 = vector.multi_reduction <add>, %3, %cst [1] : vector<16x256xf32> to vector<16xf32>
    %5 = vector.shape_cast %4 : vector<16xf32> to vector<16x1xf32>
    %cst_3 = arith.constant 2.560000e+02 : f32
    %6 = vector.broadcast %cst_3 : f32 to vector<16x1xf32>
    %7 = arith.divf %5, %6 : vector<16x1xf32>
    %cst_4 = arith.constant 9.99999997E-7 : f32
    %8 = vector.broadcast %cst_4 : f32 to vector<16x1xf32>
    %9 = arith.addf %7, %8 : vector<16x1xf32>
    %10 = math.rsqrt %9 : vector<16x1xf32>
    %11 = vector.broadcast %10 : vector<16x1xf32> to vector<16x256xf32>
    %12 = arith.mulf %2, %11 : vector<16x256xf32>
    %13 = arith.truncf %12 : vector<16x256xf32> to vector<16x256xbf16>
    %14 = vector.broadcast %1 : vector<1x256xbf16> to vector<16x256xbf16>
    %15 = arith.mulf %13, %14 : vector<16x256xbf16>
    %c0_5 = arith.constant 0 : index
    %c0_6 = arith.constant 0 : index
    %16 = vector.load %arg3[%c0_5, %c0_6] : memref<256x512xbf16, #tpu.memory_space<vmem>>, vector<256x512xbf16>
    %cst_7 = arith.constant dense<0.000000e+00> : vector<16x512xf32>
    %17 = tpu.matmul %15, %16, %cst_7 {dimension_numbers = #tpu.dot_dimension_numbers<[1], [0], [0], [1], [0, 0, 1, 1], [], []>} : vector<16x256xbf16>, vector<256x512xbf16>, vector<16x512xf32> -> vector<16x512xf32>
    %c0_8 = arith.constant 0 : index
    %c0_9 = arith.constant 0 : index
    %18 = vector.load %arg4[%c0_8, %c0_9] : memref<256x512xbf16, #tpu.memory_space<vmem>>, vector<256x512xbf16>
    %cst_10 = arith.constant dense<0.000000e+00> : vector<16x512xf32>
    %19 = tpu.matmul %15, %18, %cst_10 {dimension_numbers = #tpu.dot_dimension_numbers<[1], [0], [0], [1], [0, 0, 1, 1], [], []>} : vector<16x256xbf16>, vector<256x512xbf16>, vector<16x512xf32> -> vector<16x512xf32>
    %20 = arith.negf %17 : vector<16x512xf32>
    %21 = math.exp %20 : vector<16x512xf32>
    %cst_11 = arith.constant 1.000000e+00 : f32
    %22 = vector.broadcast %cst_11 : f32 to vector<16x512xf32>
    %23 = arith.addf %22, %21 : vector<16x512xf32>
    %24 = arith.divf %22, %23 : vector<16x512xf32>
    %25 = arith.mulf %17, %24 : vector<16x512xf32>
    %26 = arith.mulf %25, %19 : vector<16x512xf32>
    %27 = arith.truncf %26 : vector<16x512xf32> to vector<16x512xbf16>
    %c0_12 = arith.constant 0 : index
    %c0_13 = arith.constant 0 : index
    %28 = vector.load %arg5[%c0_12, %c0_13] : memref<512x256xbf16, #tpu.memory_space<vmem>>, vector<512x256xbf16>
    %cst_14 = arith.constant dense<0.000000e+00> : vector<16x256xf32>
    %29 = tpu.matmul %27, %28, %cst_14 {dimension_numbers = #tpu.dot_dimension_numbers<[1], [0], [0], [1], [0, 0, 1, 1], [], []>} : vector<16x512xbf16>, vector<512x256xbf16>, vector<16x256xf32> -> vector<16x256xf32>
    %30 = arith.truncf %29 : vector<16x256xf32> to vector<16x256xbf16>
    %31 = arith.addf %0, %30 : vector<16x256xbf16>
    %c0_15 = arith.constant 0 : index
    %c0_16 = arith.constant 0 : index
    %32 = vector.load %arg6[%c0_15, %c0_16] : memref<16x256xbf16, #tpu.memory_space<vmem>>, vector<16x256xbf16>
    tpu.vector_store %arg6[%c0_15, %c0_16], %31 {strides = array<i32>} : memref<16x256xbf16, #tpu.memory_space<vmem>>, vector<16x256xbf16>,
    return
  }
  func.func @transform_0(%arg0: i32) -> (i32, i32) {
    %c0_i32 = arith.constant 0 : i32
    %c0_i32_0 = arith.constant 0 : i32
    return %arg0, %c0_i32 : i32, i32
  }
  func.func @transform_1(%arg0: i32) -> (i32, i32) {
    %c0_i32 = arith.constant 0 : i32
    %c0_i32_0 = arith.constant 0 : i32
    %c0_i32_1 = arith.constant 0 : i32
    return %c0_i32, %c0_i32_0 : i32, i32
  }
  func.func @transform_2(%arg0: i32) -> (i32, i32) {
    %c0_i32 = arith.constant 0 : i32
    %c0_i32_0 = arith.constant 0 : i32
    %c0_i32_1 = arith.constant 0 : i32
    return %c0_i32, %c0_i32_0 : i32, i32
  }
  func.func @transform_3(%arg0: i32) -> (i32, i32) {
    %c0_i32 = arith.constant 0 : i32
    %c0_i32_0 = arith.constant 0 : i32
    %c0_i32_1 = arith.constant 0 : i32
    return %c0_i32, %c0_i32_0 : i32, i32
  }
  func.func @transform_4(%arg0: i32) -> (i32, i32) {
    %c0_i32 = arith.constant 0 : i32
    %c0_i32_0 = arith.constant 0 : i32
    %c0_i32_1 = arith.constant 0 : i32
    return %c0_i32, %c0_i32_0 : i32, i32
  }
  func.func @transform_5(%arg0: i32) -> (i32, i32) {
    %c0_i32 = arith.constant 0 : i32
    %c0_i32_0 = arith.constant 0 : i32
    return %arg0, %c0_i32 : i32, i32
  }
}

</mosaic_0001>

<bundles_post_ra>
// kernel: _ffn_fast_call.1
= control target key start
LH: loop header
LB: loop body
LE: loop exit
PB: predicated region body
PF: predicated region fallthrough
CT: control target
= control target key end

     0   :  { %10 = vsyncpa [#allocation3], 0  ;;  %s2478_s0 = inlined_call_operand.hbm [shape: bf16[16,256], index: 0, kind: input, shape index: {}]   ;;  %s2479_s1 = inlined_call_operand.vmem [shape: bf16[1,256], index: 1, kind: input, shape index: {}]   ;;  %s2480_s2 = inlined_call_operand.hbm [shape: bf16[256,512], index: 2, kind: input, shape index: {}]   ;;  %s2481_s3 = inlined_call_operand.hbm [shape: bf16[256,512], index: 3, kind: input, shape index: {}]   ;;  %s2482_s4 = inlined_call_operand.hbm [shape: bf16[512,256], index: 4, kind: input, shape index: {}]   ;;  %s2483_s5 = inlined_call_operand.hbm [shape: bf16[16,256], index: 5, kind: output, shape index: {}]  }
   0x1   :  { %11 = vsyncpa [#allocation6], 0 }
   0x2   :  { %12 = vsyncpa [#allocation9], 0 }
   0x3   :  { %13 = vsyncpa [#allocation4], 0  ;;  %s2321_s18 = smov [#allocation5]   ;;  %s2203_s22 = scalar_lea.hbm %s2480_s2, 8192 }
   0x4   :  { %s33_s19 = sshll.u32 %s2321_s18, 4  ;;  %p2204_p0 = scmp.ne.s32.totalorder %s2480_s2, %s2203_s22  ;;  %s34_s19 = int_to_ptr.vmem [resolvable:$true] %s33_s19 }
   0x5   :  { %p2207_p1 = scmp.lt.u32.totalorder %s2203_s22, %s2480_s2 }
   0x7   :  { %p2209_p2 = pnand %p2207_p1, %p2204_p0 }
   0x9   :  { %2212 = shalt.err (!%p2209_p2)
}
   0xa   :  { %s2213_s27 = scalar_lea.vmem %s34_s19, 8192  ;;  %p2218_p4 = scmp.lt.s32.totalorder %s34_s19, %s34_s19 }
   0xb   :  { %p2214_p3 = scmp.ne.s32.totalorder %s34_s19, %s2213_s27  ;;  %p2219_p5 = scmp.lt.s32.totalorder %s2213_s27, %s2213_s27 }
   0xd   :  { %p2220_p6 = por %p2219_p5, %p2218_p4 }
   0xf   :  { %p2221_p7 = pnand %p2220_p6, %p2214_p3 }
  0x11   :  { %2224 = shalt.err (!%p2221_p7)
}
  0x12   :  { %s2322_s28 = smov 256   ;;  %s2323_s29 = smov 16  }
  0x13   :  { %39 = dma.hbm_to_vmem [thread:$0]  %s2480_s2, 8192, %s34_s19, [#allocation6], %s2322_s28, %s2322_s28, %s2323_s29  }
  0x14   :  { %s2324_s7 = smov [#allocation2]   ;;  %s2225_s11 = scalar_lea.hbm %s2478_s0, 256 }
  0x15   :  { %s19_s8 = sshll.u32 %s2324_s7, 4  ;;  %p2226_p8 = scmp.ne.s32.totalorder %s2478_s0, %s2225_s11  ;;  %s20_s8 = int_to_ptr.vmem [resolvable:$true] %s19_s8 }
  0x16   :  { %p2229_p9 = scmp.lt.u32.totalorder %s2225_s11, %s2478_s0 }
  0x18   :  { %p2231_p10 = pnand %p2229_p9, %p2226_p8 }
  0x1a   :  { %2234 = shalt.err (!%p2231_p10)
}
  0x1b   :  { %s2235_s16 = scalar_lea.vmem %s20_s8, 256  ;;  %p2240_p12 = scmp.lt.s32.totalorder %s20_s8, %s20_s8 }
  0x1c   :  { %p2236_p11 = scmp.ne.s32.totalorder %s20_s8, %s2235_s16  ;;  %p2241_p13 = scmp.lt.s32.totalorder %s2235_s16, %s2235_s16 }
  0x1e   :  { %p2242_p0 = por %p2241_p13, %p2240_p12 }
  0x20   :  { %p2243_p1 = pnand %p2242_p0, %p2236_p11 }
  0x22   :  { %2246 = shalt.err (!%p2243_p1)
}
  0x23   :  { %s2325_s2 = smov 128   ;;  %s2326_s17 = smov 8  }
  0x24   :  { %25 = dma.hbm_to_vmem [thread:$0]  %s2478_s0, 256, %s20_s8, [#allocation3], %s2325_s2, %s2325_s2, %s2326_s17  }
  0x25   :  { %s2327_s20 = smov [#allocation7]   ;;  %s2328_s22 = smov [#allocation8]  }
  0x26   :  { %s45_s21 = sshll.u32 %s2327_s20, 4  ;;  %s57_s23 = sshll.u32 %s2328_s22, 4  ;;  %s46_s21 = int_to_ptr.vmem [resolvable:$true] %s45_s21  ;;  %s2391_s23 = int_to_ptr.vmem [resolvable:$true] %s57_s23 }
  0x27   :  { %s2247_s26 = scalar_lea.hbm %s2481_s3, 8192 }
  0x28   :  { %p2248_p2 = scmp.ne.s32.totalorder %s2481_s3, %s2247_s26  ;;  %p2251_p3 = scmp.lt.u32.totalorder %s2247_s26, %s2481_s3 }
  0x2a   :  { %p2253_p4 = pnand %p2251_p3, %p2248_p2 }
  0x2c   :  { %2256 = shalt.err (!%p2253_p4)
}
  0x2d   :  { %s2257_s0 = scalar_lea.vmem %s46_s21, 8192  ;;  %p2262_p6 = scmp.lt.s32.totalorder %s46_s21, %s46_s21 }
  0x2e   :  { %p2258_p5 = scmp.ne.s32.totalorder %s46_s21, %s2257_s0  ;;  %p2263_p7 = scmp.lt.s32.totalorder %s2257_s0, %s2257_s0 }
  0x30   :  { %p2264_p8 = por %p2263_p7, %p2262_p6 }
  0x32   :  { %p2265_p9 = pnand %p2264_p8, %p2258_p5 }
  0x34   :  { %2268 = shalt.err (!%p2265_p9)
}
  0x35   :  { %51 = dma.hbm_to_vmem [thread:$0]  %s2481_s3, 8192, %s46_s21, [#allocation6], %s2322_s28, %s2322_s28, %s2323_s29  }
  0x36   :  { %s2269_s12 = scalar_lea.hbm %s2482_s4, 8192 }
  0x37   :  { %p2270_p10 = scmp.ne.s32.totalorder %s2482_s4, %s2269_s12  ;;  %p2273_p11 = scmp.lt.u32.totalorder %s2269_s12, %s2482_s4 }
  0x39   :  { %p2275_p12 = pnand %p2273_p11, %p2270_p10 }
  0x3b   :  { %2278 = shalt.err (!%p2275_p12)
}
  0x3c   :  { %s2279_s18 = scalar_lea.vmem %s2391_s23, 8192  ;;  %p2284_p0 = scmp.lt.s32.totalorder %s2391_s23, %s2391_s23 }
  0x3d   :  { %p2280_p13 = scmp.ne.s32.totalorder %s2391_s23, %s2279_s18  ;;  %p2285_p1 = scmp.lt.s32.totalorder %s2279_s18, %s2279_s18 }
  0x3f   :  { %p2286_p2 = por %p2285_p1, %p2284_p0 }
  0x41   :  { %p2287_p3 = pnand %p2286_p2, %p2280_p13 }
  0x43   :  { %2290 = shalt.err (!%p2287_p3)
}
  0x44   :  { %63 = dma.hbm_to_vmem [thread:$0]  %s2482_s4, 8192, %s2391_s23, [#allocation9], %s2325_s2, %s2325_s2, %s2326_s17  }
  0x45   :  { %2313 = dma.done.wait [#allocation3], 256  }
  0x46   :  { %2314 = vsyncadd [#allocation3], 4294967040 }
  0x47   :  { %2315 = dma.done.wait [#allocation6], 16384  }
  0x48   :  { %2316 = vsyncadd [#allocation6], 4294950912 }
  0x49   :  { %2317 = dma.done.wait [#allocation9], 8192  }
  0x4a   :  { %2318 = vsyncadd [#allocation9], 4294959104  ;;  %v76_v0 = vld [vmem:[#allocation2] sm:$0xff]  ;;  %v77_v1 = vld [vmem:[#allocation2 + $0x8] sm:$0xff] }
  0x4b   :  { %v2428_v2 = vunpack.c.l.bf16 %v76_v0  ;;  %v2430_v3 = vunpack.c.h.bf16 %v76_v0  ;;  %v2432_v4 = vunpack.c.l.bf16 %v77_v1  ;;  %v2434_v5 = vunpack.c.h.bf16 %v77_v1  ;;  %v1877_v6 = vld [vmem:[#allocation5 + $0x4] ss:$16 sps:$4 sm:$0xff]   ;;  %v1879_v7 = vld [vmem:[#allocation5] ss:$16 sps:$4 sm:$0xff]  }
  0x4c   :  { %v1880_v8 = vld [vmem:[#allocation7 + $0x4] ss:$16 sps:$4 sm:$0xff]   ;;  %529 = vmatprep.subr.bf16.mxu1 %v1877_v6  ;;  %v1882_v13 = vld [vmem:[#allocation7] ss:$16 sps:$4 sm:$0xff]  }
  0x4d   :  { %v83_v9 = vmul.f32 %v2428_v2, %v2428_v2  ;;  %v84_v10 = vmul.f32 %v2430_v3, %v2430_v3  ;;  %v85_v11 = vmul.f32 %v2432_v4, %v2432_v4  ;;  %v86_v12 = vmul.f32 %v2434_v5, %v2434_v5  ;;  %530 = vmatpush1.bf16.msra.mxu1 %v1879_v7  ;;  %v1883_v14 = vld [vmem:[#allocation5 + $0x24] ss:$16 sps:$4 sm:$0xff]   ;;  %v1885_v15 = vld [vmem:[#allocation5 + $0x20] ss:$16 sps:$4 sm:$0xff]  }
  0x4e   :  { %999 = vmatprep.subr.bf16.mxu0 %v1880_v8  ;;  %v1886_v17 = vld [vmem:[#allocation7 + $0x24] ss:$16 sps:$4 sm:$0xff]   ;;  %v1888_v18 = vld [vmem:[#allocation7 + $0x20] ss:$16 sps:$4 sm:$0xff]   ;;  %531 = vmatprep.subr.bf16.mxu1 %v1883_v14 }
  0x4f   :  { %v87_v16 = vadd.f32 %v84_v10, %v83_v9  ;;  %1000 = vmatpush1.bf16.msra.mxu0 %v1882_v13  ;;  %v1889_v19 = vld [vmem:[#allocation5 + $0x44] ss:$16 sps:$4 sm:$0xff]   ;;  %v90_v20 = vadd.f32 %v86_v12, %v85_v11  ;;  %v1891_v21 = vld [vmem:[#allocation5 + $0x40] ss:$16 sps:$4 sm:$0xff]  }
  0x50   :  { %1001 = vmatprep.subr.bf16.mxu0 %v1886_v17  ;;  %v1892_v22 = vld [vmem:[#allocation7 + $0x44] ss:$16 sps:$4 sm:$0xff]   ;;  %v1894_v23 = vld [vmem:[#allocation7 + $0x40] ss:$16 sps:$4 sm:$0xff]   ;;  %v2329_v17 = vmov 1966171168  }
  0x51   :  { %88 = vadd.xlane.f32.xlu0 %v87_v16  ;;  %532 = vmatpush1.bf16.msra.mxu1 %v1885_v15  ;;  %v1895_v24 = vld [vmem:[#allocation5 + $0x64] ss:$16 sps:$4 sm:$0xff]   ;;  %v1897_v26 = vld [vmem:[#allocation5 + $0x60] ss:$16 sps:$4 sm:$0xff]   ;;  %v1975_v16 = vld [vmem:[#allocation5 + $0xc] ss:$16 sps:$4 sm:$0xff]  }
  0x52   :  { %533 = vmatprep.subr.bf16.mxu1 %v1889_v19  ;;  %v1898_v25 = vld [vmem:[#allocation7 + $0x64] ss:$16 sps:$4 sm:$0xff]   ;;  %v1900_v27 = vld [vmem:[#allocation7 + $0x60] ss:$16 sps:$4 sm:$0xff]   ;;  %v118_v19 = vlaneseq }
  0x53   :  { %1002 = vmatpush1.bf16.msra.mxu0 %v1888_v18  ;;  %v1901_v28 = vld [vmem:[#allocation5 + $0x84] ss:$16 sps:$4 sm:$0xff]   ;;  %v1903_v30 = vld [vmem:[#allocation5 + $0x80] ss:$16 sps:$4 sm:$0xff]   ;;  %v116_v18 = vunpack.c.l.s4 %v2329_v17  ;;  %v2005_v17 = vld [vmem:[#allocation5 + $0x14c] ss:$16 sps:$4 sm:$0xff]  }
  0x54   :  { %1003 = vmatprep.subr.bf16.mxu0 %v1892_v22  ;;  %v1904_v29 = vld [vmem:[#allocation7 + $0x84] ss:$16 sps:$4 sm:$0xff]   ;;  %v1906_v31 = vld [vmem:[#allocation7 + $0x80] ss:$16 sps:$4 sm:$0xff]  }
  0x55   :  { %91 = vadd.xlane.f32.xlu0 %v90_v20  ;;  %534 = vmatpush1.bf16.msra.mxu1 %v1891_v21  ;;  %v1907_v32 = vld [vmem:[#allocation5 + $0xa4] ss:$16 sps:$4 sm:$0xff]   ;;  %v1909_v34 = vld [vmem:[#allocation5 + $0xa0] ss:$16 sps:$4 sm:$0xff]  }
  0x56   :  { %535 = vmatprep.subr.bf16.mxu1 %v1895_v24  ;;  %v1910_v33 = vld [vmem:[#allocation7 + $0xa4] ss:$16 sps:$4 sm:$0xff]   ;;  %v1912_v35 = vld [vmem:[#allocation7 + $0xa0] ss:$16 sps:$4 sm:$0xff]   ;;  %v119_v24 = vshrl.u32 %v118_v19, 7 }
  0x57   :  { %1004 = vmatpush1.bf16.msra.mxu0 %v1894_v23  ;;  %v1913_v36 = vld [vmem:[#allocation5 + $0xc4] ss:$16 sps:$4 sm:$0xff]   ;;  %v1915_v38 = vld [vmem:[#allocation5 + $0xc0] ss:$16 sps:$4 sm:$0xff]   ;;  %v117_v23 = vunpack.c.0.s8 %v116_v18  ;;  %v2003_v18 = vld [vmem:[#allocation5 + $0x148] ss:$16 sps:$4 sm:$0xff]  }
  0x58   :  { %1005 = vmatprep.subr.bf16.mxu0 %v1898_v25  ;;  %v1916_v37 = vld [vmem:[#allocation7 + $0xc4] ss:$16 sps:$4 sm:$0xff]   ;;  %v1918_v39 = vld [vmem:[#allocation7 + $0xc0] ss:$16 sps:$4 sm:$0xff]   ;;  %v2008_v19 = vld [vmem:[#allocation5 + $0x16c] ss:$16 sps:$4 sm:$0xff]  }
  0x59   :  { %536 = vmatpush1.bf16.msra.mxu1 %v1897_v26  ;;  %v1919_v40 = vld [vmem:[#allocation5 + $0xe4] ss:$16 sps:$4 sm:$0xff]   ;;  %v1921_v42 = vld [vmem:[#allocation5 + $0xe0] ss:$16 sps:$4 sm:$0xff]  }
  0x5a   :  { %537 = vmatprep.subr.bf16.mxu1 %v1901_v28  ;;  %v1922_v41 = vld [vmem:[#allocation7 + $0xe4] ss:$16 sps:$4 sm:$0xff]   ;;  %v1924_v43 = vld [vmem:[#allocation7 + $0xe0] ss:$16 sps:$4 sm:$0xff]  }
  0x5b   :  { %1006 = vmatpush1.bf16.msra.mxu0 %v1900_v27  ;;  %v1925_v44 = vld [vmem:[#allocation5 + $0x104] ss:$16 sps:$4 sm:$0xff]   ;;  %v1927_v46 = vld [vmem:[#allocation5 + $0x100] ss:$16 sps:$4 sm:$0xff]  }
  0x5c   :  { %1007 = vmatprep.subr.bf16.mxu0 %v1904_v29  ;;  %v1928_v45 = vld [vmem:[#allocation7 + $0x104] ss:$16 sps:$4 sm:$0xff]   ;;  %v1930_v47 = vld [vmem:[#allocation7 + $0x100] ss:$16 sps:$4 sm:$0xff]  }
  0x5d   :  { %538 = vmatpush1.bf16.msra.mxu1 %v1903_v30  ;;  %v1931_v48 = vld [vmem:[#allocation5 + $0x124] ss:$16 sps:$4 sm:$0xff]   ;;  %v1933_v50 = vld [vmem:[#allocation5 + $0x120] ss:$16 sps:$4 sm:$0xff]   ;;  %v120_v30 = vsub.s32 %v117_v23, %v119_v24  ;;  %v2014_v23 = vld [vmem:[#allocation5 + $0x1ac] ss:$16 sps:$4 sm:$0xff]  }
  0x5e   :  { %539 = vmatprep.subr.bf16.mxu1 %v1907_v32  ;;  %v1934_v49 = vld [vmem:[#allocation7 + $0x124] ss:$16 sps:$4 sm:$0xff]   ;;  %v1936_v51 = vld [vmem:[#allocation7 + $0x120] ss:$16 sps:$4 sm:$0xff]  }
  0x5f   :  { %1008 = vmatpush1.bf16.msra.mxu0 %v1906_v31  ;;  %v1937_v52 = vld [vmem:[#allocation5 + $0x144] ss:$16 sps:$4 sm:$0xff]   ;;  %v1939_v54 = vld [vmem:[#allocation5 + $0x140] ss:$16 sps:$4 sm:$0xff]  }
  0x60   :  { %1009 = vmatprep.subr.bf16.mxu0 %v1910_v33  ;;  %v1940_v53 = vld [vmem:[#allocation7 + $0x144] ss:$16 sps:$4 sm:$0xff]   ;;  %v1942_v55 = vld [vmem:[#allocation7 + $0x140] ss:$16 sps:$4 sm:$0xff]   ;;  %v134_v33 = vsub.s32 0, %v119_v24 }
  0x61   :  { %540 = vmatpush1.bf16.msra.mxu1 %v1909_v34  ;;  %v1943_v56 = vld [vmem:[#allocation5 + $0x164] ss:$16 sps:$4 sm:$0xff]   ;;  %v1945_v58 = vld [vmem:[#allocation5 + $0x160] ss:$16 sps:$4 sm:$0xff]   ;;  %v2012_v24 = vld [vmem:[#allocation5 + $0x1a8] ss:$16 sps:$4 sm:$0xff]  }
  0x62   :  { %541 = vmatprep.subr.bf16.mxu1 %v1913_v36  ;;  %v1946_v57 = vld [vmem:[#allocation7 + $0x164] ss:$16 sps:$4 sm:$0xff]   ;;  %v1948_v59 = vld [vmem:[#allocation7 + $0x160] ss:$16 sps:$4 sm:$0xff]  }
  0x63   :  { %1010 = vmatpush1.bf16.msra.mxu0 %v1912_v35  ;;  %v1949_v60 = vld [vmem:[#allocation5 + $0x184] ss:$16 sps:$4 sm:$0xff]   ;;  %v1951_v62 = vld [vmem:[#allocation5 + $0x180] ss:$16 sps:$4 sm:$0xff]  }
  0x64   :  { %1011 = vmatprep.subr.bf16.mxu0 %v1916_v37  ;;  %v1952_v61 = vld [vmem:[#allocation7 + $0x184] ss:$16 sps:$4 sm:$0xff]   ;;  %v1954_v63 = vld [vmem:[#allocation7 + $0x180] ss:$16 sps:$4 sm:$0xff]  }
  0x65   :  { %542 = vmatpush1.bf16.msra.mxu1 %v1915_v38  ;;  %v1955_v0 = vld [vmem:[#allocation5 + $0x1a4] ss:$16 sps:$4 sm:$0xff]   ;;  %v1957_v6 = vld [vmem:[#allocation5 + $0x1a0] ss:$16 sps:$4 sm:$0xff]  }
  0x66   :  { %543 = vmatprep.subr.bf16.mxu1 %v1919_v40  ;;  %v1958_v1 = vld [vmem:[#allocation7 + $0x1a4] ss:$16 sps:$4 sm:$0xff]   ;;  %v1960_v7 = vld [vmem:[#allocation7 + $0x1a0] ss:$16 sps:$4 sm:$0xff]  }
  0x67   :  { %1012 = vmatpush1.bf16.msra.mxu0 %v1918_v39  ;;  %v1961_v8 = vld [vmem:[#allocation5 + $0x1c4] ss:$16 sps:$4 sm:$0xff]   ;;  %v1963_v10 = vld [vmem:[#allocation5 + $0x1c0] ss:$16 sps:$4 sm:$0xff]  }
  0x68   :  { %1013 = vmatprep.subr.bf16.mxu0 %v1922_v41  ;;  %v1964_v9 = vld [vmem:[#allocation7 + $0x1c4] ss:$16 sps:$4 sm:$0xff]   ;;  %v1966_v11 = vld [vmem:[#allocation7 + $0x1c0] ss:$16 sps:$4 sm:$0xff]  }
  0x69   :  { %544 = vmatpush1.bf16.msra.mxu1 %v1921_v42  ;;  %v1967_v12 = vld [vmem:[#allocation5 + $0x1e4] ss:$16 sps:$4 sm:$0xff]   ;;  %v1969_v14 = vld [vmem:[#allocation5 + $0x1e0] ss:$16 sps:$4 sm:$0xff]  }
  0x6a   :  { %545 = vmatprep.subr.bf16.mxu1 %v1925_v44  ;;  %v1970_v13 = vld [vmem:[#allocation7 + $0x1e4] ss:$16 sps:$4 sm:$0xff]   ;;  %v1972_v15 = vld [vmem:[#allocation7 + $0x1e0] ss:$16 sps:$4 sm:$0xff]  }
  0x6b   :  { %1014 = vmatpush1.bf16.msra.mxu0 %v1924_v43  ;;  %v1658_v26 = vld.sshfl [vmem:[%s2479_s1] sm:$0x11 pattern:$0x75316420]  ;;  %s2330_s1 = smov [#allocation10]  }
  0x6c   :  { %1015 = vmatprep.subr.bf16.mxu0 %v1928_v45  ;;  %v114_v29 = vcombine.high %v1658_v26, %v1658_v26  ;;  %v121_v32 = vrot.slane %v1658_v26, %v120_v30  ;;  %v2015_v26 = vld [vmem:[#allocation5 + $0x1c8] ss:$16 sps:$4 sm:$0xff]   ;;  %s1644_s19 = sshll.u32 %s2330_s1, 4  ;;  %s1645_s19 = int_to_ptr.vmem [resolvable:$true] %s1644_s19 }
  0x6d   :  { %546 = vmatpush1.bf16.msra.mxu1 %v1927_v46  ;;  %s2291_s20 = scalar_lea.vmem %s1645_s19, 256  ;;  %p2296_p5 = scmp.lt.s32.totalorder %s1645_s19, %s1645_s19 }
  0x6e   :  { %547 = vmatprep.subr.bf16.mxu1 %v1931_v48  ;;  %v128_v31 = vrot.slane %v114_v29, %v120_v30  ;;  %v130_v35 = vpack.i.b16 %v121_v32, %v121_v32  ;;  %v2023_v29 = vld [vmem:[#allocation7 + $0xc] ss:$16 sps:$4 sm:$0xff]   ;;  %v2021_v30 = vld [vmem:[#allocation7 + $0x8] ss:$16 sps:$4 sm:$0xff]   ;;  %p2292_p4 = scmp.ne.s32.totalorder %s1645_s19, %s2291_s20  ;;  %p2297_p6 = scmp.lt.s32.totalorder %s2291_s20, %s2291_s20 }
  0x6f   :  { %1016 = vmatpush1.bf16.msra.mxu0 %v1930_v47  ;;  %v1973_v47 = vld [vmem:[#allocation5 + $0x8] ss:$16 sps:$4 sm:$0xff]  }
  0x70   :  { %1017 = vmatprep.subr.bf16.mxu0 %v1934_v49  ;;  %v137_v34 = vpack.i.b16 %v128_v31, %v128_v31  ;;  %v135_v39 = vrot.slane %v130_v35, %v134_v33  ;;  %v1978_v49 = vld [vmem:[#allocation5 + $0x2c] ss:$16 sps:$4 sm:$0xff]   ;;  %v2024_v32 = vld [vmem:[#allocation7 + $0x28] ss:$16 sps:$4 sm:$0xff]   ;;  %p2298_p7 = por %p2297_p6, %p2296_p5 }
  0x71   :  { %548 = vmatpush1.bf16.msra.mxu1 %v1933_v50  ;;  %v1981_v50 = vld [vmem:[#allocation5 + $0x4c] ss:$16 sps:$4 sm:$0xff]  }
  0x72   :  { %549 = vmatprep.subr.bf16.mxu1 %v1937_v52  ;;  %v142_v38 = vrot.slane %v137_v34, %v134_v33  ;;  %v2077_v52 = vld [vmem:[#allocation8 + $0x24] ss:$8 sps:$4 sm:$0xff]   ;;  %v2027_v34 = vld [vmem:[#allocation7 + $0x48] ss:$16 sps:$4 sm:$0xff]   ;;  %p2299_p8 = pnand %p2298_p7, %p2292_p4 }
  0x73   :  { %1018 = vmatpush1.bf16.msra.mxu0 %v1936_v51  ;;  %v2072_v51 = vld [vmem:[#allocation8 + $0x10] ss:$8 sps:$4 sm:$0xff]   ;;  %v2026_v31 = vld [vmem:[#allocation7 + $0x2c] ss:$16 sps:$4 sm:$0xff]  }
  0x74   :  { %1019 = vmatprep.subr.bf16.mxu0 %v1940_v53  ;;  %v1979_v53 = vld [vmem:[#allocation5 + $0x48] ss:$16 sps:$4 sm:$0xff]   ;;  %v2029_v33 = vld [vmem:[#allocation7 + $0x4c] ss:$16 sps:$4 sm:$0xff]  }
  0x75   :  { %550 = vmatpush1.bf16.msra.mxu1 %v1939_v54  ;;  %v1984_v54 = vld [vmem:[#allocation5 + $0x6c] ss:$16 sps:$4 sm:$0xff]  }
  0x76   :  { %551 = vmatprep.subr.bf16.mxu1 %v1943_v56  ;;  %v2080_v56 = vld [vmem:[#allocation8 + $0x34] ss:$8 sps:$4 sm:$0xff]  }
  0x77   :  { %1020 = vmatpush1.bf16.msra.mxu0 %v1942_v55  ;;  %v2075_v55 = vld [vmem:[#allocation8 + $0x20] ss:$8 sps:$4 sm:$0xff]   ;;  %v2032_v35 = vld [vmem:[#allocation7 + $0x6c] ss:$16 sps:$4 sm:$0xff]  }
  0x78   :  { %1021 = vmatprep.subr.bf16.mxu0 %v1946_v57  ;;  %v1982_v57 = vld [vmem:[#allocation5 + $0x68] ss:$16 sps:$4 sm:$0xff]  }
  0x79   :  { %552 = vmatpush1.bf16.msra.mxu1 %v1945_v58  ;;  %v1987_v58 = vld [vmem:[#allocation5 + $0x8c] ss:$16 sps:$4 sm:$0xff]  }
  0x7a   :  { %553 = vmatprep.subr.bf16.mxu1 %v1949_v60  ;;  %v2083_v60 = vld [vmem:[#allocation8 + $0x44] ss:$8 sps:$4 sm:$0xff]  }
  0x7b   :  { %1022 = vmatpush1.bf16.msra.mxu0 %v1948_v59  ;;  %v2078_v59 = vld [vmem:[#allocation8 + $0x30] ss:$8 sps:$4 sm:$0xff]  }
  0x7c   :  { %1023 = vmatprep.subr.bf16.mxu0 %v1952_v61  ;;  %v1985_v61 = vld [vmem:[#allocation5 + $0x88] ss:$16 sps:$4 sm:$0xff]  }
  0x7d   :  { %554 = vmatpush1.bf16.msra.mxu1 %v1951_v62  ;;  %v1990_v62 = vld [vmem:[#allocation5 + $0xac] ss:$16 sps:$4 sm:$0xff]  }
  0x7e   :  { %555 = vmatprep.subr.bf16.mxu1 %v1955_v0  ;;  %v2086_v0 = vld [vmem:[#allocation8 + $0x54] ss:$8 sps:$4 sm:$0xff]  }
  0x7f   :  { %1024 = vmatpush1.bf16.msra.mxu0 %v1954_v63  ;;  %v2081_v63 = vld [vmem:[#allocation8 + $0x40] ss:$8 sps:$4 sm:$0xff]  }
  0x80   :  { %1025 = vmatprep.subr.bf16.mxu0 %v1958_v1  ;;  %v1988_v1 = vld [vmem:[#allocation5 + $0xa8] ss:$16 sps:$4 sm:$0xff]  }
  0x81   :  { %556 = vmatpush1.bf16.msra.mxu1 %v1957_v6  ;;  %v1993_v6 = vld [vmem:[#allocation5 + $0xcc] ss:$16 sps:$4 sm:$0xff]  }
  0x82   :  { %557 = vmatprep.subr.bf16.mxu1 %v1961_v8  ;;  %v2089_v8 = vld [vmem:[#allocation8 + $0x64] ss:$8 sps:$4 sm:$0xff]  }
  0x83   :  { %1026 = vmatpush1.bf16.msra.mxu0 %v1960_v7  ;;  %v2084_v7 = vld [vmem:[#allocation8 + $0x50] ss:$8 sps:$4 sm:$0xff]  }
  0x84   :  { %1027 = vmatprep.subr.bf16.mxu0 %v1964_v9  ;;  %v1991_v9 = vld [vmem:[#allocation5 + $0xc8] ss:$16 sps:$4 sm:$0xff]  }
  0x85   :  { %558 = vmatpush1.bf16.msra.mxu1 %v1963_v10  ;;  %v1996_v10 = vld [vmem:[#allocation5 + $0xec] ss:$16 sps:$4 sm:$0xff]  }
  0x86   :  { %559 = vmatprep.subr.bf16.mxu1 %v1967_v12  ;;  %v1994_v12 = vld [vmem:[#allocation5 + $0xe8] ss:$16 sps:$4 sm:$0xff]  }
  0x87   :  { %1028 = vmatpush1.bf16.msra.mxu0 %v1966_v11  ;;  %v2087_v11 = vld [vmem:[#allocation8 + $0x60] ss:$8 sps:$4 sm:$0xff]  }
  0x88   :  { %1029 = vmatprep.subr.bf16.mxu0 %v1970_v13  ;;  %v1999_v13 = vld [vmem:[#allocation5 + $0x10c] ss:$16 sps:$4 sm:$0xff]  }
  0x89   :  { %560 = vmatpush1.bf16.msra.mxu1 %v1969_v14  ;;  %v1997_v14 = vld [vmem:[#allocation5 + $0x108] ss:$16 sps:$4 sm:$0xff]  }
  0x8a   :  { %572 = vmatprep.subr.bf16.mxu1 %v1975_v16  ;;  %v2000_v16 = vld [vmem:[#allocation5 + $0x128] ss:$16 sps:$4 sm:$0xff]  }
  0x8b   :  { %1030 = vmatpush1.bf16.msra.mxu0 %v1972_v15  ;;  %v2002_v15 = vld [vmem:[#allocation5 + $0x12c] ss:$16 sps:$4 sm:$0xff]  }
  0xde   :  { %v89_v20 = vpop.xlane.xlu0 %88 }
  0xdf   :  { %v94_v21 = vmul.f32 0.00390625, %v89_v20  ;;  %v2006_v20 = vld [vmem:[#allocation5 + $0x168] ss:$16 sps:$4 sm:$0xff]  }
  0xe1   :  { %v96_v22 = vadd.f32 1e-06, %v94_v21  ;;  %v2011_v21 = vld [vmem:[#allocation5 + $0x18c] ss:$16 sps:$4 sm:$0xff]  }
  0xe2   :  { %v92_v25 = vpop.xlane.xlu0 %91 }
  0xe3   :  { %v95_v27 = vmul.f32 0.00390625, %v92_v25  ;;  %2165 = vrsqrt.f32 %v96_v22  ;;  %v2009_v22 = vld [vmem:[#allocation5 + $0x188] ss:$16 sps:$4 sm:$0xff]   ;;  %v2017_v25 = vld [vmem:[#allocation5 + $0x1cc] ss:$16 sps:$4 sm:$0xff]  }
  0xe5   :  { %v97_v28 = vadd.f32 1e-06, %v95_v27  ;;  %v2020_v27 = vld [vmem:[#allocation5 + $0x1ec] ss:$16 sps:$4 sm:$0xff]  }
  0xe7   :  { %2167 = vrsqrt.f32 %v97_v28  ;;  %v2018_v28 = vld [vmem:[#allocation5 + $0x1e8] ss:$16 sps:$4 sm:$0xff]  }
  0xed   :  { %v2166_v36 = vpop.eup %2165 }
  0xee   :  { %v101_v40 = vmul.f32 %v2166_v36, %v2430_v3  ;;  %v100_v42 = vmul.f32 %v2166_v36, %v2428_v2  ;;  %v2069_v3 = vld [vmem:[#allocation8] ss:$8 sps:$4 sm:$0xff]   ;;  %v2071_v2 = vld [vmem:[#allocation8 + $0x4] ss:$8 sps:$4 sm:$0xff]  }
  0xef   :  { %1537 = vmatprep.subr.bf16.mxu0 %v2071_v2  ;;  %v2030_v36 = vld [vmem:[#allocation7 + $0x68] ss:$16 sps:$4 sm:$0xff]   ;;  %v2098_v2 = vld [vmem:[#allocation8 + $0x94] ss:$8 sps:$4 sm:$0xff]  }
  0xf1   :  { %v2168_v37 = vpop.eup %2167 }
  0xf2   :  { %v103_v41 = vmul.f32 %v2168_v37, %v2434_v5  ;;  %v102_v43 = vmul.f32 %v2168_v37, %v2432_v4  ;;  %v1976_v4 = vld [vmem:[#allocation5 + $0x28] ss:$16 sps:$4 sm:$0xff]   ;;  %v2074_v5 = vld [vmem:[#allocation8 + $0x14] ss:$8 sps:$4 sm:$0xff]  }
  0xf3   :  { %v2035_v37 = vld [vmem:[#allocation7 + $0x8c] ss:$16 sps:$4 sm:$0xff]  }
  0xf4   :  { %v105_v44 = vpack.c.bf16 %v103_v41, %v101_v40  ;;  %v104_v45 = vpack.c.bf16 %v102_v43, %v100_v42  ;;  %v2036_v40 = vld [vmem:[#allocation7 + $0xa8] ss:$16 sps:$4 sm:$0xff]   ;;  %v2041_v41 = vld [vmem:[#allocation7 + $0xcc] ss:$16 sps:$4 sm:$0xff]  }
  0xf5   :  { %v2092_v42 = vld [vmem:[#allocation8 + $0x74] ss:$8 sps:$4 sm:$0xff]   ;;  %v2090_v43 = vld [vmem:[#allocation8 + $0x70] ss:$8 sps:$4 sm:$0xff]  }
  0xf6   :  { %v2451_v46 = vmul.bf16 %v142_v38, %v105_v44  ;;  %v2453_v48 = vmul.bf16 %v135_v39, %v104_v45  ;;  %v2033_v38 = vld [vmem:[#allocation7 + $0x88] ss:$16 sps:$4 sm:$0xff]   ;;  %v2038_v39 = vld [vmem:[#allocation7 + $0xac] ss:$16 sps:$4 sm:$0xff]  }
  0xf7   :  { %v2039_v44 = vld [vmem:[#allocation7 + $0xc8] ss:$16 sps:$4 sm:$0xff]   ;;  %v2044_v45 = vld [vmem:[#allocation7 + $0xec] ss:$16 sps:$4 sm:$0xff]  }
  0xf8   :  { %561 = vmatprep.mubr.bf16.mxu1 %v2451_v46  ;;  %1031 = vmatprep.mubr.bf16.mxu0 %v2451_v46 }
  0xf9   :  { %562 = vmatmul.mubr.bf16.vlgmr.msra.gmra.mrb[0].mxu1 %v2453_v48  ;;  %1032 = vmatmul.mubr.bf16.vlgmr.msra.gmra.mrb[0].mxu0 %v2453_v48 }
  0xfa   :  { %573 = vmatpush1.bf16.msra.mxu1 %v1973_v47  ;;  %604 = vmatprep.mubr.bf16.mxu1 %v2451_v46  ;;  %v2093_v47 = vld [vmem:[#allocation8 + $0x80] ss:$8 sps:$4 sm:$0xff]  }
  0xfb   :  { %574 = vmatprep.subr.bf16.mxu1 %v1978_v49  ;;  %1538 = vmatpush1.bf16.msra.mxu0 %v2069_v3  ;;  %v2042_v49 = vld [vmem:[#allocation7 + $0xe8] ss:$16 sps:$4 sm:$0xff]   ;;  %v2047_v3 = vld [vmem:[#allocation7 + $0x10c] ss:$16 sps:$4 sm:$0xff]  }
  0xfc   :  { %1539 = vmatprep.subr.bf16.mxu0 %v2074_v5  ;;  %v2045_v5 = vld [vmem:[#allocation7 + $0x108] ss:$16 sps:$4 sm:$0xff]  }
  0xfe   :  { %575 = vmatpush1.bf16.msra.mxu1 %v1976_v4  ;;  %v2096_v4 = vld [vmem:[#allocation8 + $0x90] ss:$8 sps:$4 sm:$0xff]  }
  0xff   :  { %576 = vmatprep.subr.bf16.mxu1 %v1981_v50  ;;  %1540 = vmatpush1.bf16.msra.mxu0 %v2072_v51  ;;  %v2050_v50 = vld [vmem:[#allocation7 + $0x12c] ss:$16 sps:$4 sm:$0xff]  }
 0x100   :  { %1541 = vmatprep.subr.bf16.mxu0 %v2077_v52  ;;  %v2101_v51 = vld [vmem:[#allocation8 + $0xa4] ss:$8 sps:$4 sm:$0xff]   ;;  %v2099_v52 = vld [vmem:[#allocation8 + $0xa0] ss:$8 sps:$4 sm:$0xff]  }
 0x102   :  { %577 = vmatpush1.bf16.msra.mxu1 %v1979_v53  ;;  %v2048_v53 = vld [vmem:[#allocation7 + $0x128] ss:$16 sps:$4 sm:$0xff]  }
 0x103   :  { %578 = vmatprep.subr.bf16.mxu1 %v1984_v54  ;;  %1542 = vmatpush1.bf16.msra.mxu0 %v2075_v55  ;;  %v2053_v54 = vld [vmem:[#allocation7 + $0x14c] ss:$16 sps:$4 sm:$0xff]  }
 0x104   :  { %1543 = vmatprep.subr.bf16.mxu0 %v2080_v56  ;;  %v2104_v55 = vld [vmem:[#allocation8 + $0xb4] ss:$8 sps:$4 sm:$0xff]   ;;  %v2102_v56 = vld [vmem:[#allocation8 + $0xb0] ss:$8 sps:$4 sm:$0xff]  }
 0x106   :  { %579 = vmatpush1.bf16.msra.mxu1 %v1982_v57  ;;  %v2051_v57 = vld [vmem:[#allocation7 + $0x148] ss:$16 sps:$4 sm:$0xff]  }
 0x107   :  { %580 = vmatprep.subr.bf16.mxu1 %v1987_v58  ;;  %1544 = vmatpush1.bf16.msra.mxu0 %v2078_v59  ;;  %v2056_v58 = vld [vmem:[#allocation7 + $0x16c] ss:$16 sps:$4 sm:$0xff]  }
 0x108   :  { %1545 = vmatprep.subr.bf16.mxu0 %v2083_v60  ;;  %v2107_v59 = vld [vmem:[#allocation8 + $0xc4] ss:$8 sps:$4 sm:$0xff]   ;;  %v2105_v60 = vld [vmem:[#allocation8 + $0xc0] ss:$8 sps:$4 sm:$0xff]  }
 0x10a   :  { %581 = vmatpush1.bf16.msra.mxu1 %v1985_v61  ;;  %v2054_v61 = vld [vmem:[#allocation7 + $0x168] ss:$16 sps:$4 sm:$0xff]  }
 0x10b   :  { %582 = vmatprep.subr.bf16.mxu1 %v1990_v62  ;;  %1546 = vmatpush1.bf16.msra.mxu0 %v2081_v63  ;;  %v2059_v62 = vld [vmem:[#allocation7 + $0x18c] ss:$16 sps:$4 sm:$0xff]  }
 0x10c   :  { %1547 = vmatprep.subr.bf16.mxu0 %v2086_v0  ;;  %v2110_v63 = vld [vmem:[#allocation8 + $0xd4] ss:$8 sps:$4 sm:$0xff]   ;;  %v2108_v0 = vld [vmem:[#allocation8 + $0xd0] ss:$8 sps:$4 sm:$0xff]  }
 0x10e   :  { %583 = vmatpush1.bf16.msra.mxu1 %v1988_v1  ;;  %v2057_v1 = vld [vmem:[#allocation7 + $0x188] ss:$16 sps:$4 sm:$0xff]  }
 0x10f   :  { %584 = vmatprep.subr.bf16.mxu1 %v1993_v6  ;;  %1548 = vmatpush1.bf16.msra.mxu0 %v2084_v7  ;;  %v2062_v6 = vld [vmem:[#allocation7 + $0x1ac] ss:$16 sps:$4 sm:$0xff]  }
 0x110   :  { %1549 = vmatprep.subr.bf16.mxu0 %v2089_v8  ;;  %v2113_v7 = vld [vmem:[#allocation8 + $0xe4] ss:$8 sps:$4 sm:$0xff]   ;;  %v2111_v8 = vld [vmem:[#allocation8 + $0xe0] ss:$8 sps:$4 sm:$0xff]  }
 0x112   :  { %585 = vmatpush1.bf16.msra.mxu1 %v1991_v9  ;;  %v2060_v9 = vld [vmem:[#allocation7 + $0x1a8] ss:$16 sps:$4 sm:$0xff]  }
 0x113   :  { %586 = vmatprep.subr.bf16.mxu1 %v1996_v10  ;;  %1550 = vmatpush1.bf16.msra.mxu0 %v2087_v11  ;;  %v2065_v10 = vld [vmem:[#allocation7 + $0x1cc] ss:$16 sps:$4 sm:$0xff]  }
 0x114   :  { %1551 = vmatprep.subr.bf16.mxu0 %v2092_v42  ;;  %v2116_v11 = vld [vmem:[#allocation8 + $0xf4] ss:$8 sps:$4 sm:$0xff]  }
 0x116   :  { %587 = vmatpush1.bf16.msra.mxu1 %v1994_v12  ;;  %v2114_v12 = vld [vmem:[#allocation8 + $0xf0] ss:$8 sps:$4 sm:$0xff]  }
 0x117   :  { %588 = vmatprep.subr.bf16.mxu1 %v1999_v13  ;;  %1552 = vmatpush1.bf16.msra.mxu0 %v2090_v43  ;;  %v2063_v13 = vld [vmem:[#allocation7 + $0x1c8] ss:$16 sps:$4 sm:$0xff]  }
 0x11a   :  { %589 = vmatpush1.bf16.msra.mxu1 %v1997_v14  ;;  %v2068_v14 = vld [vmem:[#allocation7 + $0x1ec] ss:$16 sps:$4 sm:$0xff]  }
 0x11b   :  { %590 = vmatprep.subr.bf16.mxu1 %v2002_v15  ;;  %v2066_v15 = vld [vmem:[#allocation7 + $0x1e8] ss:$16 sps:$4 sm:$0xff]  }
 0x11e   :  { %591 = vmatpush1.bf16.msra.mxu1 %v2000_v16  ;;  %v2119_v16 = vld [vmem:[#allocation8 + $0x104] ss:$8 sps:$4 sm:$0xff]  }
 0x11f   :  { %592 = vmatprep.subr.bf16.mxu1 %v2005_v17 }
 0x122   :  { %593 = vmatpush1.bf16.msra.mxu1 %v2003_v18 }
 0x123   :  { %594 = vmatprep.subr.bf16.mxu1 %v2008_v19 }
 0x126   :  { %595 = vmatpush1.bf16.msra.mxu1 %v2006_v20 }
 0x127   :  { %596 = vmatprep.subr.bf16.mxu1 %v2011_v21 }
 0x12a   :  { %597 = vmatpush1.bf16.msra.mxu1 %v2009_v22 }
 0x12b   :  { %598 = vmatprep.subr.bf16.mxu1 %v2014_v23 }
 0x12e   :  { %599 = vmatpush1.bf16.msra.mxu1 %v2012_v24 }
 0x12f   :  { %600 = vmatprep.subr.bf16.mxu1 %v2017_v25 }
 0x132   :  { %601 = vmatpush1.bf16.msra.mxu1 %v2015_v26 }
 0x133   :  { %602 = vmatprep.subr.bf16.mxu1 %v2020_v27 }
 0x136   :  { %603 = vmatpush1.bf16.msra.mxu1 %v2018_v28 }
 0x137   :  { %1042 = vmatprep.subr.bf16.mxu1 %v2023_v29 }
 0x139   :  { %605 = vmatmul.mubr.bf16.vlgmr.msra.gmra.mrb[4].mxu1 %v2453_v48 }
 0x13a   :  { %1043 = vmatpush1.bf16.msra.mxu1 %v2021_v30  ;;  %1074 = vmatprep.mubr.bf16.mxu1 %v2451_v46  ;;  %v2095_v46 = vld [vmem:[#allocation8 + $0x84] ss:$8 sps:$4 sm:$0xff]  }
 0x13b   :  { %1044 = vmatprep.subr.bf16.mxu1 %v2026_v31  ;;  %1553 = vmatprep.subr.bf16.mxu0 %v2095_v46 }
 0x13c   :  { %1554 = vmatpush1.bf16.msra.mxu0 %v2093_v47 }
 0x13d   :  { %1555 = vmatprep.subr.bf16.mxu0 %v2098_v2  ;;  %v2117_v2 = vld [vmem:[#allocation8 + $0x100] ss:$8 sps:$4 sm:$0xff]  }
 0x13e   :  { %1045 = vmatpush1.bf16.msra.mxu1 %v2024_v32 }
 0x13f   :  { %1046 = vmatprep.subr.bf16.mxu1 %v2029_v33 }
 0x140   :  { %1556 = vmatpush1.bf16.msra.mxu0 %v2096_v4  ;;  %v2122_v4 = vld [vmem:[#allocation8 + $0x114] ss:$8 sps:$4 sm:$0xff]  }
 0x141   :  { %1557 = vmatprep.subr.bf16.mxu0 %v2101_v51  ;;  %v2123_v51 = vld [vmem:[#allocation8 + $0x120] ss:$8 sps:$4 sm:$0xff]  }
 0x142   :  { %1047 = vmatpush1.bf16.msra.mxu1 %v2027_v34 }
 0x143   :  { %1048 = vmatprep.subr.bf16.mxu1 %v2032_v35 }
 0x144   :  { %1558 = vmatpush1.bf16.msra.mxu0 %v2099_v52  ;;  %v2128_v52 = vld [vmem:[#allocation8 + $0x134] ss:$8 sps:$4 sm:$0xff]  }
 0x145   :  { %1559 = vmatprep.subr.bf16.mxu0 %v2104_v55  ;;  %v2129_v55 = vld [vmem:[#allocation8 + $0x140] ss:$8 sps:$4 sm:$0xff]  }
 0x146   :  { %1049 = vmatpush1.bf16.msra.mxu1 %v2030_v36 }
 0x147   :  { %1050 = vmatprep.subr.bf16.mxu1 %v2035_v37 }
 0x148   :  { %1560 = vmatpush1.bf16.msra.mxu0 %v2102_v56  ;;  %v2134_v56 = vld [vmem:[#allocation8 + $0x154] ss:$8 sps:$4 sm:$0xff]  }
 0x149   :  { %1561 = vmatprep.subr.bf16.mxu0 %v2107_v59  ;;  %v2135_v59 = vld [vmem:[#allocation8 + $0x160] ss:$8 sps:$4 sm:$0xff]  }
 0x14a   :  { %1051 = vmatpush1.bf16.msra.mxu1 %v2033_v38 }
 0x14b   :  { %1052 = vmatprep.subr.bf16.mxu1 %v2038_v39 }
 0x14c   :  { %1562 = vmatpush1.bf16.msra.mxu0 %v2105_v60  ;;  %v2140_v60 = vld [vmem:[#allocation8 + $0x174] ss:$8 sps:$4 sm:$0xff]  }
 0x14d   :  { %1563 = vmatprep.subr.bf16.mxu0 %v2110_v63 }
 0x14e   :  { %1053 = vmatpush1.bf16.msra.mxu1 %v2036_v40 }
 0x14f   :  { %1054 = vmatprep.subr.bf16.mxu1 %v2041_v41 }
 0x150   :  { %1564 = vmatpush1.bf16.msra.mxu0 %v2108_v0 }
 0x151   :  { %1565 = vmatprep.subr.bf16.mxu0 %v2113_v7 }
 0x152   :  { %1055 = vmatpush1.bf16.msra.mxu1 %v2039_v44 }
 0x153   :  { %1056 = vmatprep.subr.bf16.mxu1 %v2044_v45 }
 0x154   :  { %1566 = vmatpush1.bf16.msra.mxu0 %v2111_v8  ;;  %v2146_v8 = vld [vmem:[#allocation8 + $0x194] ss:$8 sps:$4 sm:$0xff]  }
 0x155   :  { %1567 = vmatprep.subr.bf16.mxu0 %v2116_v11  ;;  %v2147_v11 = vld [vmem:[#allocation8 + $0x1a0] ss:$8 sps:$4 sm:$0xff]  }
 0x156   :  { %1057 = vmatpush1.bf16.msra.mxu1 %v2042_v49 }
 0x157   :  { %1058 = vmatprep.subr.bf16.mxu1 %v2047_v3 }
 0x158   :  { %1568 = vmatpush1.bf16.msra.mxu0 %v2114_v12  ;;  %v2152_v12 = vld [vmem:[#allocation8 + $0x1b4] ss:$8 sps:$4 sm:$0xff]  }
 0x159   :  { %1580 = vmatprep.subr.bf16.mxu0 %v2119_v16  ;;  %v2158_v16 = vld [vmem:[#allocation8 + $0x1d4] ss:$8 sps:$4 sm:$0xff]  }
 0x15a   :  { %1059 = vmatpush1.bf16.msra.mxu1 %v2045_v5  ;;  %v2120_v5 = vld [vmem:[#allocation8 + $0x110] ss:$8 sps:$4 sm:$0xff]  }
 0x15b   :  { %1060 = vmatprep.subr.bf16.mxu1 %v2050_v50  ;;  %v2125_v50 = vld [vmem:[#allocation8 + $0x124] ss:$8 sps:$4 sm:$0xff]  }
 0x15e   :  { %1061 = vmatpush1.bf16.msra.mxu1 %v2048_v53  ;;  %v2126_v53 = vld [vmem:[#allocation8 + $0x130] ss:$8 sps:$4 sm:$0xff]  }
 0x15f   :  { %1062 = vmatprep.subr.bf16.mxu1 %v2053_v54  ;;  %v2131_v54 = vld [vmem:[#allocation8 + $0x144] ss:$8 sps:$4 sm:$0xff]  }
 0x162   :  { %1063 = vmatpush1.bf16.msra.mxu1 %v2051_v57  ;;  %v2132_v57 = vld [vmem:[#allocation8 + $0x150] ss:$8 sps:$4 sm:$0xff]  }
 0x163   :  { %1064 = vmatprep.subr.bf16.mxu1 %v2056_v58  ;;  %v2137_v58 = vld [vmem:[#allocation8 + $0x164] ss:$8 sps:$4 sm:$0xff]  }
 0x166   :  { %1065 = vmatpush1.bf16.msra.mxu1 %v2054_v61  ;;  %v2138_v61 = vld [vmem:[#allocation8 + $0x170] ss:$8 sps:$4 sm:$0xff]  }
 0x167   :  { %1066 = vmatprep.subr.bf16.mxu1 %v2059_v62  ;;  %v2143_v62 = vld [vmem:[#allocation8 + $0x184] ss:$8 sps:$4 sm:$0xff]  }
 0x16a   :  { %1067 = vmatpush1.bf16.msra.mxu1 %v2057_v1 }
 0x16b   :  { %1068 = vmatprep.subr.bf16.mxu1 %v2062_v6  ;;  %v2141_v6 = vld [vmem:[#allocation8 + $0x180] ss:$8 sps:$4 sm:$0xff]  }
 0x16e   :  { %1069 = vmatpush1.bf16.msra.mxu1 %v2060_v9  ;;  %v2144_v9 = vld [vmem:[#allocation8 + $0x190] ss:$8 sps:$4 sm:$0xff]  }
 0x16f   :  { %1070 = vmatprep.subr.bf16.mxu1 %v2065_v10  ;;  %v2149_v10 = vld [vmem:[#allocation8 + $0x1a4] ss:$8 sps:$4 sm:$0xff]  }
 0x172   :  { %1071 = vmatpush1.bf16.msra.mxu1 %v2063_v13  ;;  %v2150_v13 = vld [vmem:[#allocation8 + $0x1b0] ss:$8 sps:$4 sm:$0xff]  }
 0x173   :  { %1072 = vmatprep.subr.bf16.mxu1 %v2068_v14  ;;  %v2155_v14 = vld [vmem:[#allocation8 + $0x1c4] ss:$8 sps:$4 sm:$0xff]  }
 0x176   :  { %1073 = vmatpush1.bf16.msra.mxu1 %v2066_v15  ;;  %v2153_v15 = vld [vmem:[#allocation8 + $0x1c0] ss:$8 sps:$4 sm:$0xff]  }
 0x179   :  { %1075 = vmatmul.mubr.bf16.vlgmr.msra.gmra.mrb[8].mxu1 %v2453_v48 }
 0x1cc   :  { %v563_v17 = vpop.f32.mrb[0].mxu1  ;;  %v1033_v18 = vpop.f32.mrb[0].mxu0 }
 0x1cd   :  { %v1787_v19 = vmul.f32 -1.442695, %v563_v17  ;;  %v565_v20 = vpop.f32.mrb[1].mxu1  ;;  %v1035_v21 = vpop.f32.mrb[1].mxu0 }
 0x1ce   :  { %v1788_v22 = vmul.f32 -1.442695, %v565_v20  ;;  %v567_v23 = vpop.f32.mrb[2].mxu1  ;;  %v1037_v24 = vpop.f32.mrb[2].mxu0 }
 0x1cf   :  { %2169 = vpow2.f32 %v1787_v19  ;;  %v1791_v25 = vmul.f32 -1.442695, %v567_v23  ;;  %v569_v26 = vpop.f32.mrb[3].mxu1  ;;  %v1039_v27 = vpop.f32.mrb[3].mxu0  ;;  %v2159_v19 = vld [vmem:[#allocation8 + $0x1e0] ss:$8 sps:$4 sm:$0xff]  }
 0x1d0   :  { %2171 = vpow2.f32 %v1788_v22  ;;  %v1792_v28 = vmul.f32 -1.442695, %v569_v26 }
 0x1d1   :  { %2173 = vpow2.f32 %v1791_v25 }
 0x1d2   :  { %2175 = vpow2.f32 %v1792_v28 }
 0x1d9   :  { %v2170_v29 = vpop.eup %2169 }
 0x1da   :  { %v2172_v48 = vpop.eup %2171  ;;  %v1109_v30 = vadd.f32 1.0, %v2170_v29 }
 0x1db   :  { %v2174_v31 = vpop.eup %2173  ;;  %v1110_v32 = vadd.f32 1.0, %v2172_v48 }
 0x1dc   :  { %v2176_v33 = vpop.eup %2175  ;;  %2177 = vrcp.f32 %v1109_v30  ;;  %v1113_v34 = vadd.f32 1.0, %v2174_v31 }
 0x1dd   :  { %2179 = vrcp.f32 %v1110_v32  ;;  %v1114_v35 = vadd.f32 1.0, %v2176_v33 }
 0x1de   :  { %2181 = vrcp.f32 %v1113_v34 }
 0x1df   :  { %2183 = vrcp.f32 %v1114_v35 }
 0x1e6   :  { %v2178_v36 = vpop.eup %2177 }
 0x1e7   :  { %v2180_v37 = vpop.eup %2179  ;;  %v1133_v38 = vmul.f32 %v2178_v36, %v563_v17  ;;  %v2156_v17 = vld [vmem:[#allocation8 + $0x1d0] ss:$8 sps:$4 sm:$0xff]  }
 0x1e8   :  { %v2182_v39 = vpop.eup %2181  ;;  %v1134_v40 = vmul.f32 %v2180_v37, %v565_v20  ;;  %v2164_v20 = vld [vmem:[#allocation8 + $0x1f4] ss:$8 sps:$4 sm:$0xff]  }
 0x1e9   :  { %v2184_v41 = vpop.eup %2183  ;;  %v1141_v42 = vmul.f32 %v1133_v38, %v1033_v18  ;;  %v1137_v43 = vmul.f32 %v2182_v39, %v567_v23  ;;  %v2161_v18 = vld [vmem:[#allocation8 + $0x1e4] ss:$8 sps:$4 sm:$0xff]   ;;  %v2162_v23 = vld [vmem:[#allocation8 + $0x1f0] ss:$8 sps:$4 sm:$0xff]  }
 0x1ea   :  { %v1142_v44 = vmul.f32 %v1134_v40, %v1035_v21  ;;  %v1138_v45 = vmul.f32 %v2184_v41, %v569_v26 }
 0x1eb   :  { %v1145_v46 = vmul.f32 %v1137_v43, %v1037_v24 }
 0x1ec   :  { %v1146_v47 = vmul.f32 %v1138_v45, %v1039_v27 }
 0x1ed   :  { %v1149_v49 = vpack.c.bf16 %v1145_v46, %v1141_v42 }
 0x1ee   :  { %v1150_v3 = vpack.c.bf16 %v1146_v47, %v1142_v44 }
 0x1f0   :  { %1569 = vmatprep.mubr.bf16.mxu0 %v1150_v3 }
 0x1f1   :  { %1570 = vmatmul.mubr.bf16.vlgmr.msra.gmra.mrb[4].mxu0 %v1149_v49 }
 0x1f2   :  { %1581 = vmatpush1.bf16.msra.mxu0 %v2117_v2 }
 0x1f3   :  { %1582 = vmatprep.subr.bf16.mxu0 %v2122_v4 }
 0x1f6   :  { %1583 = vmatpush1.bf16.msra.mxu0 %v2120_v5 }
 0x1f7   :  { %1584 = vmatprep.subr.bf16.mxu0 %v2125_v50 }
 0x1fa   :  { %1585 = vmatpush1.bf16.msra.mxu0 %v2123_v51 }
 0x1fb   :  { %1586 = vmatprep.subr.bf16.mxu0 %v2128_v52 }
 0x1fe   :  { %1587 = vmatpush1.bf16.msra.mxu0 %v2126_v53  ;;  %v2201_v53 = vld [vmem:[#allocation2] sm:$0xff] }
 0x1ff   :  { %1588 = vmatprep.subr.bf16.mxu0 %v2131_v54 }
 0x202   :  { %1589 = vmatpush1.bf16.msra.mxu0 %v2129_v55 }
 0x203   :  { %1590 = vmatprep.subr.bf16.mxu0 %v2134_v56  ;;  %v2202_v56 = vld [vmem:[#allocation2 + $0x8] sm:$0xff] }
 0x206   :  { %1591 = vmatpush1.bf16.msra.mxu0 %v2132_v57 }
 0x207   :  { %1592 = vmatprep.subr.bf16.mxu0 %v2137_v58 }
 0x20a   :  { %1593 = vmatpush1.bf16.msra.mxu0 %v2135_v59 }
 0x20b   :  { %1594 = vmatprep.subr.bf16.mxu0 %v2140_v60 }
 0x20c   :  { %v606_v63 = vpop.f32.mrb[4].mxu1 }
 0x20d   :  { %v608_v0 = vpop.f32.mrb[5].mxu1  ;;  %v1789_v21 = vmul.f32 -1.442695, %v606_v63 }
 0x20e   :  { %v610_v1 = vpop.f32.mrb[6].mxu1  ;;  %1595 = vmatpush1.bf16.msra.mxu0 %v2138_v61  ;;  %v1790_v22 = vmul.f32 -1.442695, %v608_v0 }
 0x20f   :  { %v612_v7 = vpop.f32.mrb[7].mxu1  ;;  %1596 = vmatprep.subr.bf16.mxu0 %v2143_v62  ;;  %v1793_v24 = vmul.f32 -1.442695, %v610_v1  ;;  %2185 = vpow2.f32 %v1789_v21 }
 0x210   :  { %v1794_v25 = vmul.f32 -1.442695, %v612_v7  ;;  %2187 = vpow2.f32 %v1790_v22 }
 0x211   :  { %2189 = vpow2.f32 %v1793_v24 }
 0x212   :  { %1597 = vmatpush1.bf16.msra.mxu0 %v2141_v6  ;;  %2191 = vpow2.f32 %v1794_v25 }
 0x213   :  { %1598 = vmatprep.subr.bf16.mxu0 %v2146_v8 }
 0x216   :  { %1599 = vmatpush1.bf16.msra.mxu0 %v2144_v9 }
 0x217   :  { %1600 = vmatprep.subr.bf16.mxu0 %v2149_v10 }
 0x219   :  { %v2186_v26 = vpop.eup %2185 }
 0x21a   :  { %1601 = vmatpush1.bf16.msra.mxu0 %v2147_v11  ;;  %v2188_v27 = vpop.eup %2187  ;;  %v1111_v48 = vadd.f32 1.0, %v2186_v26 }
 0x21b   :  { %1602 = vmatprep.subr.bf16.mxu0 %v2152_v12  ;;  %v2190_v28 = vpop.eup %2189  ;;  %v1112_v30 = vadd.f32 1.0, %v2188_v27 }
 0x21c   :  { %v2192_v29 = vpop.eup %2191  ;;  %v1115_v31 = vadd.f32 1.0, %v2190_v28  ;;  %2193 = vrcp.f32 %v1111_v48 }
 0x21d   :  { %v1116_v32 = vadd.f32 1.0, %v2192_v29  ;;  %2195 = vrcp.f32 %v1112_v30 }
 0x21e   :  { %1603 = vmatpush1.bf16.msra.mxu0 %v2150_v13  ;;  %2197 = vrcp.f32 %v1115_v31 }
 0x21f   :  { %1604 = vmatprep.subr.bf16.mxu0 %v2155_v14  ;;  %2199 = vrcp.f32 %v1116_v32 }
 0x222   :  { %1605 = vmatpush1.bf16.msra.mxu0 %v2153_v15 }
 0x223   :  { %1606 = vmatprep.subr.bf16.mxu0 %v2158_v16 }
 0x226   :  { %1607 = vmatpush1.bf16.msra.mxu0 %v2156_v17  ;;  %v2194_v33 = vpop.eup %2193 }
 0x227   :  { %1608 = vmatprep.subr.bf16.mxu0 %v2161_v18  ;;  %v2196_v34 = vpop.eup %2195  ;;  %v1135_v37 = vmul.f32 %v2194_v33, %v606_v63 }
 0x228   :  { %v2198_v35 = vpop.eup %2197  ;;  %v1136_v38 = vmul.f32 %v2196_v34, %v608_v0 }
 0x229   :  { %v2200_v36 = vpop.eup %2199  ;;  %v1139_v40 = vmul.f32 %v2198_v35, %v610_v1 }
 0x22a   :  { %1609 = vmatpush1.bf16.msra.mxu0 %v2159_v19  ;;  %v1140_v43 = vmul.f32 %v2200_v36, %v612_v7 }
 0x22b   :  { %1610 = vmatprep.subr.bf16.mxu0 %v2164_v20 }
 0x22e   :  { %1611 = vmatpush1.bf16.msra.mxu0 %v2162_v23 }
 0x24c   :  { %v1076_v39 = vpop.f32.mrb[8].mxu1 }
 0x24d   :  { %v1143_v41 = vmul.f32 %v1135_v37, %v1076_v39  ;;  %v1078_v42 = vpop.f32.mrb[9].mxu1 }
 0x24e   :  { %v1144_v44 = vmul.f32 %v1136_v38, %v1078_v42  ;;  %v1080_v45 = vpop.f32.mrb[10].mxu1 }
 0x24f   :  { %v1147_v46 = vmul.f32 %v1139_v40, %v1080_v45  ;;  %v1082_v47 = vpop.f32.mrb[11].mxu1 }
 0x250   :  { %v1148_v49 = vmul.f32 %v1140_v43, %v1082_v47 }
 0x251   :  { %v1151_v3 = vpack.c.bf16 %v1147_v46, %v1143_v41 }
 0x252   :  { %v1152_v2 = vpack.c.bf16 %v1148_v49, %v1144_v44 }
 0x254   :  { %1612 = vmatprep.mubr.bf16.mxu0 %v1152_v2 }
 0x255   :  { %1613 = vmatmul.mubr.bf16.vlgmr.msra.gmra.mrb[4].mxu0 %v1151_v3 }
 0x328   :  { %v1614_v4 = vpop.f32.mrb[4].mxu0 }
 0x329   :  { %v1616_v5 = vpop.f32.mrb[5].mxu0 }
 0x32a   :  { %v1861_v50 = vpack.c.bf16 %v1616_v5, %v1614_v4  ;;  %v1618_v51 = vpop.f32.mrb[6].mxu0 }
 0x32b   :  { %v1620_v52 = vpop.f32.mrb[7].mxu0 }
 0x32c   :  { %v1635_v54 = vadd.bf16 %v2201_v53, %v1861_v50  ;;  %v1862_v55 = vpack.c.bf16 %v1620_v52, %v1618_v51 }
 0x32e   :  { %1637 = vst [vmem:[#allocation10] sm:$0xff] %v1635_v54  ;;  %v1636_v57 = vadd.bf16 %v2202_v56, %v1862_v55 }
 0x330   :  { %1638 = vst [vmem:[#allocation10 + $0x8] sm:$0xff] %v1636_v57 }
 0x331   :  { %2302 = shalt.err (!%p2299_p8)
}
 0x332   :  { %s2303_s23 = scalar_lea.hbm %s2483_s5, 256 }
 0x333   :  { %p2304_p9 = scmp.ne.s32.totalorder %s2483_s5, %s2303_s23  ;;  %p2307_p10 = scmp.lt.u32.totalorder %s2303_s23, %s2483_s5 }
 0x335   :  { %p2309_p11 = pnand %p2307_p10, %p2304_p9 }
 0x337   :  { %2312 = shalt.err (!%p2309_p11)
}
 0x338   :  { %1650 = dma.vmem_to_hbm [thread:$0]  %s1645_s19, 256, %s2483_s5, [#allocation4], %s2325_s2, %s2325_s2, %s2326_s17  }
 0x339   :  { %2319 = dma.done.wait [#allocation4], 256  }
 0x33a   :  { %2320 = vsyncadd [#allocation4], 4294967040 }
 0x33b   :  { %1654 = vsyncpa [#allocation3], 1 }
 0x33c   :  { %1655 = vsyncpa [#allocation6], 1 }
 0x33d   :  { %1656 = vsyncpa [#allocation9], 1 }
 0x33e   :  { %1657 = vsyncpa [#allocation4], 1 }

</bundles_post_ra>
